<compile_context>
chip_gen: v5e
topology: v5e:2x2
jax: 0.10.0
libtpu: 0.0.40
codegen_flags: <defaults>
</compile_context>

<pallas_src>
import jax
import jax.numpy as jnp
from jax.experimental import pallas as pl
from jax.experimental.pallas import tpu as pltpu

# ----- small config consistent with BertConfig-style hidden size ---------------
B = 2      # batch
S = 8      # sequence length
H = 32     # hidden_size


def fusenet_kernel(p_ref, q_ref, w_ref, b_ref, out_ref):
    """All refs are whole-array VMEM blocks.

    p_ref, q_ref, out_ref : (B*S, H)
    w_ref                 : (H, H)   stored as (in, out) so x @ W == nn.Linear
    b_ref                 : (1, H)
    """
    p = p_ref[...]                       # (B*S, H) f32
    q = q_ref[...]                       # (B*S, H) f32

    # Fused projection: linear(q) + linear(p) == (p + q) @ W + 2*b
    s = p + q
    lsum = (
        jnp.dot(s, w_ref[...], preferred_element_type=jnp.float32)
        + 2.0 * b_ref[...]               # broadcast (1, H) over rows
    )

    # Gate and convex combination.
    mid = jax.nn.sigmoid(lsum)           # EUP transcendental path
    out = p * mid + q * (1.0 - mid)

    out_ref[...] = out.astype(out_ref.dtype)


def fusenet(p, q, w, b):
    """p, q: (B, S, H) float32.  w: (H, H) as (in, out).  b: (H,)."""
    Bx, Sx, Hx = p.shape
    p2 = p.reshape(Bx * Sx, Hx)          # contiguous 2-D slab for dense load/store
    q2 = q.reshape(Bx * Sx, Hx)
    b2 = b.reshape(1, Hx)

    vmem = pltpu.MemorySpace.VMEM
    out2 = pl.pallas_call(
        fusenet_kernel,
        out_shape=jax.ShapeDtypeStruct((Bx * Sx, Hx), jnp.float32),
        in_specs=[
            pl.BlockSpec(memory_space=vmem),   # p
            pl.BlockSpec(memory_space=vmem),   # q
            pl.BlockSpec(memory_space=vmem),   # W
            pl.BlockSpec(memory_space=vmem),   # b
        ],
        out_specs=pl.BlockSpec(memory_space=vmem),
    )(p2, q2, w, b2)

    return out2.reshape(Bx, Sx, Hx)


def fusenet_ref(p, q, w, b):
    """Pure-JAX reference matching the PyTorch forward exactly (two matmuls)."""
    lq = q @ w + b
    lp = p @ w + b
    mid = jax.nn.sigmoid(lq + lp)
    return p * mid + q * (1.0 - mid)


if __name__ == "__main__":
    key = jax.random.PRNGKey(0)
    k_p, k_q, k_w, k_b = jax.random.split(key, 4)

    # deterministic synthetic parameters / inputs
    p = jax.random.normal(k_p, (B, S, H), jnp.float32)
    q = jax.random.normal(k_q, (B, S, H), jnp.float32)
    w = 0.02 * jax.random.normal(k_w, (H, H), jnp.float32)   # (in, out) layout
    b = 0.02 * jax.random.normal(k_b, (H,), jnp.float32)

    out = fusenet(p, q, w, b)
    jax.block_until_ready(out)

    # correctness check vs. the unfused reference
    ref = fusenet_ref(p, q, w, b)
    assert out.shape == (B, S, H) and out.dtype == jnp.float32
    assert bool(jnp.allclose(out, ref, atol=1e-5, rtol=1e-5)), "mismatch vs reference"

    print("KERNEL_OK")
</pallas_src>

<mosaic_0001>
module attributes {stable_mosaic.version = 11 : i64} {
  func.func @fusenet_kernel(%arg0: memref<16x32xf32, #tpu.memory_space<vmem>>, %arg1: memref<16x32xf32, #tpu.memory_space<vmem>>, %arg2: memref<32x32xf32, #tpu.memory_space<vmem>>, %arg3: memref<1x32xf32, #tpu.memory_space<vmem>>, %arg4: memref<16x32xf32, #tpu.memory_space<vmem>>) attributes {dimension_semantics = [], scalar_prefetch = 0 : i64, scratch_operands = 0 : i64, tpu.core_type = #tpu.core_type<tc>} {
    %c0 = arith.constant 0 : index
    %c0_0 = arith.constant 0 : index
    %0 = vector.load %arg0[%c0, %c0_0] : memref<16x32xf32, #tpu.memory_space<vmem>>, vector<16x32xf32>
    %c0_1 = arith.constant 0 : index
    %c0_2 = arith.constant 0 : index
    %1 = vector.load %arg1[%c0_1, %c0_2] : memref<16x32xf32, #tpu.memory_space<vmem>>, vector<16x32xf32>
    %2 = arith.addf %0, %1 : vector<16x32xf32>
    %c0_3 = arith.constant 0 : index
    %c0_4 = arith.constant 0 : index
    %3 = vector.load %arg2[%c0_3, %c0_4] : memref<32x32xf32, #tpu.memory_space<vmem>>, vector<32x32xf32>
    %cst = arith.constant dense<0.000000e+00> : vector<16x32xf32>
    %4 = tpu.matmul %2, %3, %cst {dimension_numbers = #tpu.dot_dimension_numbers<[1], [0], [0], [1], [0, 0, 1, 1], [], []>} : vector<16x32xf32>, vector<32x32xf32>, vector<16x32xf32> -> vector<16x32xf32>
    %c0_5 = arith.constant 0 : index
    %c0_6 = arith.constant 0 : index
    %5 = vector.load %arg3[%c0_5, %c0_6] : memref<1x32xf32, #tpu.memory_space<vmem>>, vector<1x32xf32>
    %cst_7 = arith.constant 2.000000e+00 : f32
    %6 = vector.broadcast %cst_7 : f32 to vector<1x32xf32>
    %7 = arith.mulf %6, %5 : vector<1x32xf32>
    %8 = vector.broadcast %7 : vector<1x32xf32> to vector<16x32xf32>
    %9 = arith.addf %4, %8 : vector<16x32xf32>
    %10 = arith.negf %9 : vector<16x32xf32>
    %11 = math.exp %10 : vector<16x32xf32>
    %cst_8 = arith.constant 1.000000e+00 : f32
    %12 = vector.broadcast %cst_8 : f32 to vector<16x32xf32>
    %13 = arith.addf %12, %11 : vector<16x32xf32>
    %14 = arith.divf %12, %13 : vector<16x32xf32>
    %15 = arith.mulf %0, %14 : vector<16x32xf32>
    %cst_9 = arith.constant 1.000000e+00 : f32
    %16 = vector.broadcast %cst_9 : f32 to vector<16x32xf32>
    %17 = arith.subf %16, %14 : vector<16x32xf32>
    %18 = arith.mulf %1, %17 : vector<16x32xf32>
    %19 = arith.addf %15, %18 : vector<16x32xf32>
    %c0_10 = arith.constant 0 : index
    %c0_11 = arith.constant 0 : index
    %20 = vector.load %arg4[%c0_10, %c0_11] : memref<16x32xf32, #tpu.memory_space<vmem>>, vector<16x32xf32>
    tpu.vector_store %arg4[%c0_10, %c0_11], %19 {strides = array<i32>} : memref<16x32xf32, #tpu.memory_space<vmem>>, vector<16x32xf32>,
    return
  }
}

</mosaic_0001>

<bundles_post_ra>
// kernel: tpu_custom_call.1
= control target key start
LH: loop header
LB: loop body
LE: loop exit
PB: predicated region body
PF: predicated region fallthrough
CT: control target
= control target key end

     0   :  { %9 = vsyncpa [#allocation3], 0  ;;  %s380_s0 = inlined_call_operand.hbm [shape: f32[16,32], index: 0, kind: input, shape index: {}]   ;;  %s381_s1 = inlined_call_operand.hbm [shape: f32[16,32], index: 1, kind: input, shape index: {}]   ;;  %s382_s2 = inlined_call_operand.hbm [shape: f32[32,32], index: 2, kind: input, shape index: {}]   ;;  %s383_s3 = inlined_call_operand.vmem [shape: f32[1,32], index: 3, kind: input, shape index: {}]   ;;  %s384_s4 = inlined_call_operand.hbm [shape: f32[16,32], index: 4, kind: output, shape index: {}]  }
   0x1   :  { %10 = vsyncpa [#allocation6], 0 }
   0x2   :  { %11 = vsyncpa [#allocation4], 0  ;;  %s29_s17 = sshll.u32 %s381_s1, 4  ;;  %s302_s18 = smov [#allocation5]   ;;  %s30_s17 = int_to_ptr.hbm [resolvable:$true] %s29_s17 }
   0x3   :  { %s31_s19 = sshll.u32 %s302_s18, 4  ;;  %s16_s22 = sshll.u32 %s380_s0, 4  ;;  %s32_s19 = int_to_ptr.vmem [resolvable:$true] %s31_s19  ;;  %s17_s22 = int_to_ptr.hbm [resolvable:$true] %s16_s22 }
   0x4   :  { %s303_s23 = smov 128   ;;  %s304_s24 = smov 8  }
   0x5   :  { %37 = dma.hbm_to_vmem [thread:$0]  %s30_s17, 256, %s32_s19, [#allocation6], %s303_s23, %s303_s23, %s304_s24  }
   0x6   :  { %s305_s25 = smov [#allocation2]   ;;  %s42_s1 = sshll.u32 %s382_s2, 4  ;;  %s43_s1 = int_to_ptr.hbm [resolvable:$true] %s42_s1 }
   0x7   :  { %s18_s26 = sshll.u32 %s305_s25, 4  ;;  %s306_s0 = smov [#allocation7]   ;;  %s19_s26 = int_to_ptr.vmem [resolvable:$true] %s18_s26 }
   0x8   :  { %24 = dma.hbm_to_vmem [thread:$0]  %s17_s22, 256, %s19_s26, [#allocation3], %s303_s23, %s303_s23, %s304_s24  }
   0x9   :  { %s44_s29 = sshll.u32 %s306_s0, 4  ;;  %s45_s29 = int_to_ptr.vmem [resolvable:$true] %s44_s29 }
   0xa   :  { %50 = dma.hbm_to_vmem [thread:$0]  %s43_s1, 512, %s45_s29, [#allocation6], %s303_s23, %s303_s23, %s304_s24  }
   0xb   :  { %296 = dma.done.wait [#allocation3], 256  }
   0xc   :  { %297 = vsyncadd [#allocation3], 4294967040 }
   0xd   :  { %298 = dma.done.wait [#allocation6], 768  }
   0xe   :  { %299 = vsyncadd [#allocation6], 4294966528  ;;  %v74_v0 = vld [vmem:[#allocation7 + $0x18] sm:$0xff]  ;;  %v73_v1 = vld [vmem:[#allocation7 + $0x10] sm:$0xff]  ;;  %vm80_vm0 = vcmask 261120   ;;  %s164_s8 = sshll.u32 %s384_s4, 4  ;;  %s165_s8 = int_to_ptr.hbm [resolvable:$true] %s164_s8 }
   0xf   :  { %99 = vmatpush.msra.mxu0 %v74_v0  ;;  %182 = vmatpush.msra.mxu1 %v74_v0  ;;  %v351_v2 = vld [vmem:[#allocation2] sm:$0xff]  ;;  %v353_v3 = vld [vmem:[#allocation5] sm:$0xff]  ;;  %v72_v4 = vld [vmem:[#allocation7 + $0x8] sm:$0xff] }
  0x10   :  { %v355_v5 = vld [vmem:[#allocation2 + $0x8] sm:$0xff]  ;;  %v357_v6 = vld [vmem:[#allocation5 + $0x8] sm:$0xff]  ;;  %v71_v7 = vld [vmem:[#allocation7] sm:$0xff]  ;;  %v69_v8 = vadd.f32 %v353_v3, %v351_v2 }
  0x11   :  { %100 = vmatpush.msra.mxu0 %v73_v1  ;;  %183 = vmatpush.msra.mxu1 %v73_v1  ;;  %v70_v9 = vadd.f32 %v357_v6, %v355_v5  ;;  %v75_v10 = vld [vmem:[%s383_s3] sm:$0x1]  ;;  %s307_s3 = smov [#allocation8]  }
  0x12   :  { %v76_v11 = vmul.f32 2.0, %v75_v10  ;;  %s162_s5 = sshll.u32 %s307_s3, 4  ;;  %s163_s5 = int_to_ptr.vmem [resolvable:$true] %s162_s5 }
  0x13   :  { %101 = vmatpush.msra.mxu0 %v72_v4  ;;  %184 = vmatpush.msra.mxu1 %v72_v4 }
  0x14   :  { %v78_v12 = vperm.slane %v76_v11, 0 }
  0x15   :  { %102 = vmatpush.msra.mxu0 %v71_v7  ;;  %185 = vmatpush.msra.mxu1 %v71_v7 }
  0x16   :  { %178 = vmatmul.msk.f32.vlgmr.msra.gmra.mxu0 %vm80_vm0, %v69_v8  ;;  %179 = vmatmul.msk.f32.vlgmr.msra.gmra.mxu1 %vm80_vm0, %v70_v9 }
  0x93   :  { %v104_v13 = vpop.f32.mrf.mxu0  ;;  %v107_v14 = vpop.f32.mrf.mxu1 }
  0x94   :  { %v105_v15 = vadd.f32 %v104_v13, %v78_v12  ;;  %v108_v16 = vadd.f32 %v107_v14, %v78_v12 }
  0x96   :  { %v180_v17 = vmul.f32 -1.442695, %v105_v15  ;;  %v181_v18 = vmul.f32 -1.442695, %v108_v16 }
  0x98   :  { %192 = vpow2.f32 %v180_v17 }
  0x99   :  { %194 = vpow2.f32 %v181_v18 }
  0x9e   :  { %v193_v19 = vpop.eup %192 }
  0x9f   :  { %v195_v20 = vpop.eup %194  ;;  %v116_v21 = vadd.f32 1.0, %v193_v19 }
  0xa0   :  { %v117_v22 = vadd.f32 1.0, %v195_v20 }
  0xa1   :  { %196 = vrcp.f32 %v116_v21  ;;  %v129_v28 = vand.u32 2147483648, %v116_v21  ;;  %v127_v31 = vand.u32 2147483647, %v116_v21  ;;  %vm123_vm3 = vweird.f32 %v116_v21 }
  0xa2   :  { %198 = vrcp.f32 %v117_v22  ;;  %v144_v32 = vand.u32 2147483648, %v117_v22  ;;  %v142_v34 = vand.u32 2147483647, %v117_v22  ;;  %vm138_vm5 = vweird.f32 %v117_v22 }
  0xa3   :  { %v130_v36 = vor.u32 1.1754944e-38, %v129_v28  ;;  %vm128_vm7 = vcmp.eq.f32.partialorder %v127_v31, 8.507059e+37 }
  0xa4   :  { %v145_v38 = vor.u32 1.1754944e-38, %v144_v32  ;;  %vm143_vm8 = vcmp.eq.f32.partialorder %v142_v34, 8.507059e+37 }
  0xa7   :  { %v197_v23 = vpop.eup %196 }
  0xa8   :  { %v199_v24 = vpop.eup %198  ;;  %v119_v25 = vmul.f32 %v197_v23, %v116_v21  ;;  %vm124_vm1 = vweird.f32 %v197_v23 }
  0xa9   :  { %v134_v26 = vmul.f32 %v199_v24, %v117_v22  ;;  %vm139_vm2 = vweird.f32 %v199_v24  ;;  %vm125_vm4 = vmor %vm123_vm3, %vm124_vm1 }
  0xaa   :  { %v120_v27 = vsub.f32 1.0, %v119_v25  ;;  %vm140_vm6 = vmor %vm138_vm5, %vm139_vm2 }
  0xab   :  { %v135_v29 = vsub.f32 1.0, %v134_v26 }
  0xac   :  { %v121_v30 = vmul.f32 %v197_v23, %v120_v27 }
  0xad   :  { %v136_v33 = vmul.f32 %v199_v24, %v135_v29 }
  0xae   :  { %v122_v35 = vadd.f32 %v197_v23, %v121_v30 }
  0xaf   :  { %v137_v37 = vadd.f32 %v199_v24, %v136_v33 }
  0xb0   :  { %v126_v39 = vsel %vm125_vm4, %v197_v23, %v122_v35 }
  0xb1   :  { %v131_v40 = vsel %vm128_vm7, %v130_v36, %v126_v39  ;;  %v141_v41 = vsel %vm140_vm6, %v199_v24, %v137_v37 }
  0xb2   :  { %v146_v42 = vsel %vm143_vm8, %v145_v38, %v141_v41  ;;  %v150_v43 = vsub.f32 1.0, %v131_v40  ;;  %v148_v45 = vmul.f32 %v131_v40, %v351_v2 }
  0xb3   :  { %v151_v44 = vsub.f32 1.0, %v146_v42  ;;  %v149_v47 = vmul.f32 %v146_v42, %v355_v5 }
  0xb4   :  { %v152_v46 = vmul.f32 %v150_v43, %v353_v3 }
  0xb5   :  { %v153_v48 = vmul.f32 %v151_v44, %v357_v6 }
  0xb6   :  { %v154_v49 = vadd.f32 %v152_v46, %v148_v45 }
  0xb7   :  { %v155_v50 = vadd.f32 %v153_v48, %v149_v47 }
  0xb8   :  { %156 = vst.msk [vmem:[#allocation8] sm:$0xff] %vm80_vm0, %v154_v49 }
  0xb9   :  { %157 = vst.msk [vmem:[#allocation8 + $0x8] sm:$0xff] %vm80_vm0, %v155_v50 }
  0xba   :  { %170 = dma.vmem_to_hbm [thread:$0]  %s163_s5, 256, %s165_s8, [#allocation4], %s303_s23, %s303_s23, %s304_s24  }
  0xbb   :  { %300 = dma.done.wait [#allocation4], 256  }
  0xbc   :  { %301 = vsyncadd [#allocation4], 4294967040 }
  0xbd   :  { %175 = vsyncpa [#allocation3], 1 }
  0xbe   :  { %176 = vsyncpa [#allocation6], 1 }
  0xbf   :  { %177 = vsyncpa [#allocation4], 1 }

</bundles_post_ra>
